<compile_context>
chip_gen: v6e
topology: v6e:2x2x1
jax: 0.10.0
libtpu: 0.0.40
codegen_flags: <defaults>
</compile_context>

<pallas_src>
import jax
import jax.numpy as jnp
import numpy as np
from jax.experimental import pallas as pl
from jax.experimental.pallas import tpu as pltpu

_LANE = 128                          # vreg lane width
_SUBLANE = 8                         # f32 sublane count
_MAX_ROW_BYTES = 512 * 1024          # cap one lane-dense row of the 2D slab
_MAX_BLOCK_BYTES = 4 * 1024 * 1024   # per-buffer tile; x2 (in+out) x2 (double
                                     # buffering) = 16 MiB < v7x's 32 MiB scoped
                                     # VMEM default (v5e/v6e have 128 MiB VMEM).


def _identity_copy_kernel(x_ref, o_ref):
    # Every SlicedNet slice is an empty nn.Sequential -> identity, regardless
    # of the `slices` argument, so one pass-through kernel serves all cases.
    o_ref[...] = x_ref[...]


def _lane_dense_layout(total_elems, itemsize):
    """Choose a (rows, cols) 2D view with cols a large multiple of 128."""
    if total_elems % _LANE != 0:
        # A single full-array block is always legal even if not lane aligned.
        return 1, total_elems
    cols = _LANE
    while total_elems % (cols * 2) == 0 and (cols * 2) * itemsize <= _MAX_ROW_BYTES:
        cols *= 2
    return total_elems // cols, cols


def sliced_net_forward(x, slices=2):
    """Pallas implementation of SlicedNet.forward(X, slices) (identity map)."""
    del slices  # all four slices are identity; no data- or shape-dependence
    orig_shape = x.shape
    total = x.size
    itemsize = jnp.dtype(x.dtype).itemsize

    rows, cols = _lane_dense_layout(total, itemsize)
    x2 = x.reshape(rows, cols)  # plain reshape preserves NCHW element order

    # Largest row tile (multiple of 8, or the full row count) whose block fits
    # the VMEM budget on all of v5e / v6e / v7x.
    rows_per_block = max(
        _SUBLANE, (_MAX_BLOCK_BYTES // (cols * itemsize)) // _SUBLANE * _SUBLANE
    )
    row_tile = min(rows, rows_per_block)
    grid = (pl.cdiv(rows, row_tile),)

    out2 = pl.pallas_call(
        _identity_copy_kernel,
        out_shape=jax.ShapeDtypeStruct((rows, cols), x.dtype),
        grid=grid,
        in_specs=[pl.BlockSpec((row_tile, cols), lambda i: (i, 0))],
        out_specs=pl.BlockSpec((row_tile, cols), lambda i: (i, 0)),
        # Output buffer is the (donated) input buffer: no extra HBM allocation,
        # and under jit-with-donation XLA can elide the defensive copy.
        input_output_aliases={0: 0},
        compiler_params=pltpu.CompilerParams(
            dimension_semantics=("parallel",),
        ),
    )(x2)
    return out2.reshape(orig_shape)


if __name__ == "__main__":
    # SlicedNet.__init__ defines no parameters (all slices are empty), so there
    # are no weights to initialize.
    key = jax.random.PRNGKey(0)
    shape = (2, 4, 16, 16)  # NCHW, matching the PyTorch module's expected input

    for s in (1, 2, 3, 4):
        xi = jax.random.normal(key, shape, dtype=jnp.float32)
        xi_host = jax.device_get(xi)  # snapshot before the (aliasing) call
        oi = jax.block_until_ready(sliced_net_forward(xi, slices=s))
        assert oi.shape == shape and oi.dtype == jnp.float32
        assert np.allclose(jax.device_get(oi), xi_host), "SlicedNet must be identity"

    print("KERNEL_OK")
</pallas_src>

<mosaic_0001>
module attributes {stable_mosaic.version = 11 : i64} {
  func.func @_identity_copy_kernel(%arg0: i32, %arg1: memref<1x2048xf32, #tpu.memory_space<vmem>>, %arg2: memref<1x2048xf32, #tpu.memory_space<vmem>>) attributes {dimension_semantics = [#tpu.dimension_semantics<parallel>], iteration_bounds = array<i64: 1>, scalar_prefetch = 0 : i64, scratch_operands = 0 : i64, tpu.core_type = #tpu.core_type<tc>, window_params = [{transform_indices = @transform_0, window_bounds = array<i64: 1, 2048>}, {transform_indices = @transform_1, window_bounds = array<i64: 1, 2048>}]} {
    %c0 = arith.constant 0 : index
    %c0_0 = arith.constant 0 : index
    %0 = vector.load %arg1[%c0, %c0_0] : memref<1x2048xf32, #tpu.memory_space<vmem>>, vector<1x2048xf32>
    %c0_1 = arith.constant 0 : index
    %c0_2 = arith.constant 0 : index
    %1 = vector.load %arg2[%c0_1, %c0_2] : memref<1x2048xf32, #tpu.memory_space<vmem>>, vector<1x2048xf32>
    tpu.vector_store %arg2[%c0_1, %c0_2], %0 {strides = array<i32>} : memref<1x2048xf32, #tpu.memory_space<vmem>>, vector<1x2048xf32>,
    return
  }
  func.func @transform_0(%arg0: i32) -> (i32, i32) {
    %c0_i32 = arith.constant 0 : i32
    %c0_i32_0 = arith.constant 0 : i32
    return %arg0, %c0_i32 : i32, i32
  }
  func.func @transform_1(%arg0: i32) -> (i32, i32) {
    %c0_i32 = arith.constant 0 : i32
    %c0_i32_0 = arith.constant 0 : i32
    return %arg0, %c0_i32 : i32, i32
  }
}

</mosaic_0001>

<bundles_post_ra>
// kernel: tpu_custom_call.1
= control target key start
LH: loop header
LB: loop body
LE: loop exit
PB: predicated region body
PF: predicated region fallthrough
CT: control target
= control target key end

     0   :  { %6 = vsyncpa [#allocation3], 0  ;;  %s104_s0 = inlined_call_operand.hbm [shape: f32[1,2048], index: 0, kind: input, shape index: {}, may-alias: {0,1}]   ;;  %s105_s1 = inlined_call_operand.hbm [shape: f32[1,2048], index: 1, kind: output, shape index: {}, may-alias: {0,1}]  }
   0x1   :  { %7 = vsyncpa [#allocation4], 0  ;;  %s86_s6 = smov [#allocation2]  }
   0x2   :  { %s14_s7 = sshll.u32 %s86_s6, 4  ;;  %s15_s7 = int_to_ptr.vmem [resolvable:$true] %s14_s7 }
   0x3   :  { %s50_s8 = scalar_lea.vmem %s15_s7, 256  ;;  %p55_p1 = scmp.lt.s32.totalorder %s15_s7, %s15_s7 }
   0x4   :  { %p51_p0 = scmp.ne.s32.totalorder %s15_s7, %s50_s8  ;;  %p56_p2 = scmp.lt.s32.totalorder %s50_s8, %s50_s8 }
   0x6   :  { %p57_p3 = por %p56_p2, %p55_p1 }
   0x8   :  { %p58_p4 = pnand %p57_p3, %p51_p0 }
   0xa   :  { %61 = shalt.err (!%p58_p4)
}
   0xb   :  { %17 = dma.hbm_to_vmem [thread:$0]  %s104_s0, 256, %s15_s7, [#allocation3]  }
   0xc   :  { %82 = dma.done.wait [#allocation3], 256  }
   0xd   :  { %83 = vsyncadd [#allocation3], 4294967040  ;;  %s87_s11 = smov [#allocation5]   ;;  %v21_v0 = vld [vmem:[#allocation2] sm:$0xff]  ;;  %v22_v1 = vld [vmem:[#allocation2 + $0x8] sm:$0xff] }
   0xe   :  { %s31_s12 = sshll.u32 %s87_s11, 4  ;;  %23 = vst [vmem:[#allocation5] sm:$0xff] %v21_v0  ;;  %24 = vst [vmem:[#allocation5 + $0x8] sm:$0xff] %v22_v1  ;;  %s32_s12 = int_to_ptr.vmem [resolvable:$true] %s31_s12 }
   0xf   :  { %s62_s13 = scalar_lea.vmem %s32_s12, 256  ;;  %p67_p6 = scmp.lt.s32.totalorder %s32_s12, %s32_s12 }
  0x10   :  { %p63_p5 = scmp.ne.s32.totalorder %s32_s12, %s62_s13  ;;  %p68_p7 = scmp.lt.s32.totalorder %s62_s13, %s62_s13 }
  0x12   :  { %p69_p8 = por %p68_p7, %p67_p6 }
  0x14   :  { %p70_p9 = pnand %p69_p8, %p63_p5 }
  0x16   :  { %73 = shalt.err (!%p70_p9)
}
  0x17   :  { %34 = dma.vmem_to_hbm [thread:$0]  %s32_s12, 256, %s105_s1, [#allocation4]  }
  0x18   :  { %84 = dma.done.wait [#allocation4], 256  }
  0x19   :  { %85 = vsyncadd [#allocation4], 4294967040 }
  0x1a   :  { %38 = vsyncpa [#allocation3], 1 }
  0x1b   :  { %39 = vsyncpa [#allocation4], 1 }

</bundles_post_ra>
